<compile_context>
chip_gen: v7x
topology: tpu7x:2x2x1
jax: 0.10.0
libtpu: 0.0.40
codegen_flags: <defaults>
</compile_context>

<pallas_src>
import jax
import jax.numpy as jnp
import numpy as np
from jax.experimental import pallas as pl
from jax.experimental.pallas import tpu as pltpu

BN_EPS = 1e-5


def ca_layer_kernel(x_ref, w1_ref, b1_ref, w2_ref, b2_ref, g_ref, beta_ref, o_ref):
    # x_ref: (B, C, blk) f32, lane-dense on the HW tile.
    w1 = w1_ref[...]            # (Cr, C)
    b1 = b1_ref[...]            # (Cr, 1)
    w2 = w2_ref[...]            # (C, Cr)
    b2 = b2_ref[...]            # (C, 1)
    g = g_ref[...]              # (C, blk)
    beta = beta_ref[...]        # (C, blk)

    B, C, blk = x_ref.shape

    # ---- conv_du: merge the per-batch matmuls into one MXU launch per conv ----
    xs = [x_ref[b] for b in range(B)]                                   # each (C, blk)
    xcat = xs[0] if B == 1 else jnp.concatenate(xs, axis=-1)            # (C, B*blk)

    h = jnp.dot(w1, xcat, preferred_element_type=jnp.float32) + b1      # (Cr, B*blk)
    h = jnp.maximum(h, 0.0)
    s = jnp.dot(w2, h, preferred_element_type=jnp.float32) + b2         # (C, B*blk)
    sig = 1.0 / (1.0 + jnp.exp(-s))                                     # exact sigmoid

    # Residual channel attention: y = x * sig + x (static, 128-aligned lane slices).
    ys = [xs[b] * sig[:, b * blk:(b + 1) * blk] + xs[b] for b in range(B)]

    # ---- BatchNorm1d (training-mode): per-feature mean / biased var over batch ----
    # Two-pass variance (numerically safer than E[y^2]-mean^2 at B=2); d_b reused.
    if B == 2:
        mean = (ys[0] + ys[1]) * 0.5
        d0 = mean - ys[1]                      # == ys[0] - mean; d1 = -d0
        var = d0 * d0                          # = (d0^2 + d1^2)/2
        scale = jax.lax.rsqrt(var + BN_EPS) * g
        t = d0 * scale
        o_ref[0] = t + beta
        o_ref[1] = beta - t
    else:
        inv_b = 1.0 / B
        mean = ys[0]
        for b in range(1, B):
            mean = mean + ys[b]
        mean = mean * inv_b
        ds = [ys[b] - mean for b in range(B)]
        var = ds[0] * ds[0]
        for b in range(1, B):
            var = var + ds[b] * ds[b]
        var = var * inv_b
        scale = jax.lax.rsqrt(var + BN_EPS) * g
        for b in range(B):
            o_ref[b] = ds[b] * scale + beta


def _pick_blk(hw: int) -> int:
    """Largest lane tile: full HW when small, capped at 8192 lanes for huge HW.

    VMEM footprint at C=16 is roughly 2*(2*B*C + 2*C)*blk*4 B (~1 KiB/lane at B=2),
    so 8192 lanes stays far below the 32 MiB default scoped limit on v5e/v6e/v7x.
    """
    if hw % 128 != 0:
        return hw  # full-extent block is always legal
    blk = hw
    while blk > 8192 and blk % 2 == 0:
        blk //= 2
    return blk


def ca_layer_forward(x_nchw, params):
    """x_nchw: (B, C, H, W) f32. Returns (B, C*H*W) f32 matching the PyTorch module."""
    B, C, H, W = x_nchw.shape
    HW = H * W
    Cr = params["w1"].shape[0]

    # Lane-dense activations: NCHW -> (B, C, HW) is a free reshape (no transpose).
    x = x_nchw.reshape(B, C, HW).astype(jnp.float32)

    # Conv weights used directly in (out, in) orientation; biases as (out, 1) columns.
    w1 = params["w1"].astype(jnp.float32)            # (Cr, C)
    b1 = params["b1"].reshape(Cr, 1).astype(jnp.float32)
    w2 = params["w2"].astype(jnp.float32)            # (C, Cr)
    b2 = params["b2"].reshape(C, 1).astype(jnp.float32)

    # BN params are in PyTorch NCHW-flatten order (c*HW + hw) == natural (C, HW).
    gamma = params["gamma"].reshape(C, HW).astype(jnp.float32)
    beta = params["beta"].reshape(C, HW).astype(jnp.float32)

    blk = _pick_blk(HW)
    grid = (HW // blk,)   # == (1,) at HW=256: single step, no per-step grid overhead

    out = pl.pallas_call(
        ca_layer_kernel,
        out_shape=jax.ShapeDtypeStruct((B, C, HW), jnp.float32),
        grid=grid,
        in_specs=[
            pl.BlockSpec((B, C, blk), lambda j: (0, 0, j)),
            pl.BlockSpec((Cr, C), lambda j: (0, 0)),
            pl.BlockSpec((Cr, 1), lambda j: (0, 0)),
            pl.BlockSpec((C, Cr), lambda j: (0, 0)),
            pl.BlockSpec((C, 1), lambda j: (0, 0)),
            pl.BlockSpec((C, blk), lambda j: (0, j)),
            pl.BlockSpec((C, blk), lambda j: (0, j)),
        ],
        out_specs=pl.BlockSpec((B, C, blk), lambda j: (0, 0, j)),
        # Only matters when HW is large enough to need multiple tiles; on v7x those
        # tiles are then sharded across its 2 TensorCores. No-op at grid=(1,).
        compiler_params=pltpu.CompilerParams(dimension_semantics=("parallel",)),
    )(x, w1, b1, w2, b2, gamma, beta)

    # (B, C, HW) is already the PyTorch NCHW flatten order: plain reshape, no transpose.
    return out.reshape(B, C * HW)


def ref_forward(x_nchw, params):
    """Pure-JAX reference mirroring the PyTorch module (training-mode BN)."""
    B, C, H, W = x_nchw.shape
    h = jnp.einsum("rc,bchw->brhw", params["w1"], x_nchw) + params["b1"][None, :, None, None]
    h = jnp.maximum(h, 0.0)
    s = jnp.einsum("cr,brhw->bchw", params["w2"], h) + params["b2"][None, :, None, None]
    y = x_nchw * jax.nn.sigmoid(s) + x_nchw
    yf = y.reshape(B, -1)
    mean = yf.mean(axis=0)
    var = ((yf - mean) ** 2).mean(axis=0)
    return (yf - mean) / jnp.sqrt(var + BN_EPS) * params["gamma"] + params["beta"]


def init_params(key, channel, reduction, feat):
    cr = channel // reduction
    k1, k2, k3, k4, k5, k6 = jax.random.split(key, 6)
    return {
        "w1": 0.1 * jax.random.normal(k1, (cr, channel), jnp.float32),
        "b1": 0.1 * jax.random.normal(k2, (cr,), jnp.float32),
        "w2": 0.1 * jax.random.normal(k3, (channel, cr), jnp.float32),
        "b2": 0.1 * jax.random.normal(k4, (channel,), jnp.float32),
        "gamma": 1.0 + 0.1 * jax.random.normal(k5, (feat,), jnp.float32),
        "beta": 0.1 * jax.random.normal(k6, (feat,), jnp.float32),
    }


if __name__ == "__main__":
    # C*H*W must equal 4096 to match BatchNorm1d(4096): C=16, H=16, W=16.
    B, C, H, W = 2, 16, 16, 16
    reduction = 8

    key = jax.random.PRNGKey(0)
    kx, kp = jax.random.split(key)
    x = jax.random.normal(kx, (B, C, H, W), jnp.float32)
    params = init_params(kp, C, reduction, C * H * W)

    out = jax.block_until_ready(ca_layer_forward(x, params))
    ref = jax.block_until_ready(ref_forward(x, params))

    assert out.shape == (B, C * H * W)
    np.testing.assert_allclose(np.asarray(out), np.asarray(ref), rtol=2e-3, atol=2e-3)

    # TODO(synk): BatchNorm1d running_mean/running_var EMA buffer updates (training
    # side effect) are not produced; only the normalized forward output is returned.
    print("KERNEL_OK")
</pallas_src>

<mosaic_0001>
module attributes {stable_mosaic.version = 11 : i64} {
  func.func @ca_layer_kernel(%arg0: i32, %arg1: memref<2x16x256xf32, #tpu.memory_space<vmem>>, %arg2: memref<2x16xf32, #tpu.memory_space<vmem>>, %arg3: memref<2x1xf32, #tpu.memory_space<vmem>>, %arg4: memref<16x2xf32, #tpu.memory_space<vmem>>, %arg5: memref<16x1xf32, #tpu.memory_space<vmem>>, %arg6: memref<16x256xf32, #tpu.memory_space<vmem>>, %arg7: memref<16x256xf32, #tpu.memory_space<vmem>>, %arg8: memref<2x16x256xf32, #tpu.memory_space<vmem>>) attributes {dimension_semantics = [#tpu.dimension_semantics<parallel>], iteration_bounds = array<i64: 1>, scalar_prefetch = 0 : i64, scratch_operands = 0 : i64, tpu.core_type = #tpu.core_type<tc>, window_params = [{transform_indices = @transform_0, window_bounds = array<i64: 2, 16, 256>}, {pipeline_mode = #tpu.pipeline_mode<synchronous>, transform_indices = @transform_1, window_bounds = array<i64: 2, 16>}, {pipeline_mode = #tpu.pipeline_mode<synchronous>, transform_indices = @transform_2, window_bounds = array<i64: 2, 1>}, {pipeline_mode = #tpu.pipeline_mode<synchronous>, transform_indices = @transform_3, window_bounds = array<i64: 16, 2>}, {pipeline_mode = #tpu.pipeline_mode<synchronous>, transform_indices = @transform_4, window_bounds = array<i64: 16, 1>}, {transform_indices = @transform_5, window_bounds = array<i64: 16, 256>}, {transform_indices = @transform_6, window_bounds = array<i64: 16, 256>}, {transform_indices = @transform_7, window_bounds = array<i64: 2, 16, 256>}]} {
    %c0 = arith.constant 0 : index
    %c0_0 = arith.constant 0 : index
    %0 = vector.load %arg2[%c0, %c0_0] : memref<2x16xf32, #tpu.memory_space<vmem>>, vector<2x16xf32>
    %c0_1 = arith.constant 0 : index
    %c0_2 = arith.constant 0 : index
    %1 = vector.load %arg3[%c0_1, %c0_2] : memref<2x1xf32, #tpu.memory_space<vmem>>, vector<2x1xf32>
    %c0_3 = arith.constant 0 : index
    %c0_4 = arith.constant 0 : index
    %2 = vector.load %arg4[%c0_3, %c0_4] : memref<16x2xf32, #tpu.memory_space<vmem>>, vector<16x2xf32>
    %c0_5 = arith.constant 0 : index
    %c0_6 = arith.constant 0 : index
    %3 = vector.load %arg5[%c0_5, %c0_6] : memref<16x1xf32, #tpu.memory_space<vmem>>, vector<16x1xf32>
    %c0_7 = arith.constant 0 : index
    %c0_8 = arith.constant 0 : index
    %4 = vector.load %arg6[%c0_7, %c0_8] : memref<16x256xf32, #tpu.memory_space<vmem>>, vector<16x256xf32>
    %c0_9 = arith.constant 0 : index
    %c0_10 = arith.constant 0 : index
    %5 = vector.load %arg7[%c0_9, %c0_10] : memref<16x256xf32, #tpu.memory_space<vmem>>, vector<16x256xf32>
    %c0_11 = arith.constant 0 : index
    %c0_12 = arith.constant 0 : index
    %c0_13 = arith.constant 0 : index
    %6 = vector.load %arg1[%c0_11, %c0_12, %c0_13] : memref<2x16x256xf32, #tpu.memory_space<vmem>>, vector<1x16x256xf32>
    %7 = vector.shape_cast %6 : vector<1x16x256xf32> to vector<16x256xf32>
    %c1 = arith.constant 1 : index
    %c0_14 = arith.constant 0 : index
    %c0_15 = arith.constant 0 : index
    %8 = vector.load %arg1[%c1, %c0_14, %c0_15] : memref<2x16x256xf32, #tpu.memory_space<vmem>>, vector<1x16x256xf32>
    %9 = vector.shape_cast %8 : vector<1x16x256xf32> to vector<16x256xf32>
    %10 = tpu.concatenate %7, %9 in 1 : vector<16x256xf32>, vector<16x256xf32> -> vector<16x512xf32>
    %cst = arith.constant dense<0.000000e+00> : vector<2x512xf32>
    %11 = tpu.matmul %0, %10, %cst {dimension_numbers = #tpu.dot_dimension_numbers<[1], [0], [0], [1], [0, 0, 1, 1], [], []>} : vector<2x16xf32>, vector<16x512xf32>, vector<2x512xf32> -> vector<2x512xf32>
    %12 = vector.broadcast %1 : vector<2x1xf32> to vector<2x512xf32>
    %13 = arith.addf %11, %12 : vector<2x512xf32>
    %cst_16 = arith.constant 0.000000e+00 : f32
    %14 = vector.broadcast %cst_16 : f32 to vector<2x512xf32>
    %15 = arith.maximumf %13, %14 : vector<2x512xf32>
    %cst_17 = arith.constant dense<0.000000e+00> : vector<16x512xf32>
    %16 = tpu.matmul %2, %15, %cst_17 {dimension_numbers = #tpu.dot_dimension_numbers<[1], [0], [0], [1], [0, 0, 1, 1], [], []>} : vector<16x2xf32>, vector<2x512xf32>, vector<16x512xf32> -> vector<16x512xf32>
    %17 = vector.broadcast %3 : vector<16x1xf32> to vector<16x512xf32>
    %18 = arith.addf %16, %17 : vector<16x512xf32>
    %cst_18 = arith.constant 0.000000e+00 : f32
    %19 = vector.broadcast %cst_18 : f32 to vector<16x512xf32>
    %20 = arith.subf %19, %18 : vector<16x512xf32>
    %21 = math.exp %20 : vector<16x512xf32>
    %cst_19 = arith.constant 1.000000e+00 : f32
    %22 = vector.broadcast %cst_19 : f32 to vector<16x512xf32>
    %23 = arith.addf %22, %21 : vector<16x512xf32>
    %cst_20 = arith.constant 1.000000e+00 : f32
    %24 = vector.broadcast %cst_20 : f32 to vector<16x512xf32>
    %25 = arith.divf %24, %23 : vector<16x512xf32>
    %26 = vector.extract_strided_slice %25 {offsets = [0, 0], sizes = [16, 256], strides = [1, 1]} : vector<16x512xf32> to vector<16x256xf32>
    %27 = arith.mulf %7, %26 : vector<16x256xf32>
    %28 = arith.addf %27, %7 : vector<16x256xf32>
    %29 = vector.extract_strided_slice %25 {offsets = [0, 256], sizes = [16, 256], strides = [1, 1]} : vector<16x512xf32> to vector<16x256xf32>
    %30 = arith.mulf %9, %29 : vector<16x256xf32>
    %31 = arith.addf %30, %9 : vector<16x256xf32>
    %32 = arith.addf %28, %31 : vector<16x256xf32>
    %cst_21 = arith.constant 5.000000e-01 : f32
    %33 = vector.broadcast %cst_21 : f32 to vector<16x256xf32>
    %34 = arith.mulf %32, %33 : vector<16x256xf32>
    %35 = arith.subf %34, %31 : vector<16x256xf32>
    %36 = arith.mulf %35, %35 : vector<16x256xf32>
    %cst_22 = arith.constant 9.99999974E-6 : f32
    %37 = vector.broadcast %cst_22 : f32 to vector<16x256xf32>
    %38 = arith.addf %36, %37 : vector<16x256xf32>
    %39 = math.rsqrt %38 : vector<16x256xf32>
    %40 = arith.mulf %39, %4 : vector<16x256xf32>
    %41 = arith.mulf %35, %40 : vector<16x256xf32>
    %42 = arith.addf %41, %5 : vector<16x256xf32>
    %c0_23 = arith.constant 0 : index
    %c0_24 = arith.constant 0 : index
    %c0_25 = arith.constant 0 : index
    %43 = vector.load %arg8[%c0_23, %c0_24, %c0_25] : memref<2x16x256xf32, #tpu.memory_space<vmem>>, vector<1x16x256xf32>
    %44 = vector.shape_cast %43 : vector<1x16x256xf32> to vector<16x256xf32>
    %45 = vector.shape_cast %42 : vector<16x256xf32> to vector<1x16x256xf32>
    tpu.vector_store %arg8[%c0_23, %c0_24, %c0_25], %45 {strides = array<i32>} : memref<2x16x256xf32, #tpu.memory_space<vmem>>, vector<1x16x256xf32>,
    %46 = arith.subf %5, %41 : vector<16x256xf32>
    %c1_26 = arith.constant 1 : index
    %c0_27 = arith.constant 0 : index
    %c0_28 = arith.constant 0 : index
    %47 = vector.load %arg8[%c1_26, %c0_27, %c0_28] : memref<2x16x256xf32, #tpu.memory_space<vmem>>, vector<1x16x256xf32>
    %48 = vector.shape_cast %47 : vector<1x16x256xf32> to vector<16x256xf32>
    %49 = vector.shape_cast %46 : vector<16x256xf32> to vector<1x16x256xf32>
    tpu.vector_store %arg8[%c1_26, %c0_27, %c0_28], %49 {strides = array<i32>} : memref<2x16x256xf32, #tpu.memory_space<vmem>>, vector<1x16x256xf32>,
    return
  }
  func.func @transform_0(%arg0: i32) -> (i32, i32, i32) {
    %c0_i32 = arith.constant 0 : i32
    %c0_i32_0 = arith.constant 0 : i32
    %c0_i32_1 = arith.constant 0 : i32
    return %c0_i32, %c0_i32_0, %arg0 : i32, i32, i32
  }
  func.func @transform_1(%arg0: i32) -> (i32, i32) {
    %c0_i32 = arith.constant 0 : i32
    %c0_i32_0 = arith.constant 0 : i32
    %c0_i32_1 = arith.constant 0 : i32
    return %c0_i32, %c0_i32_0 : i32, i32
  }
  func.func @transform_2(%arg0: i32) -> (i32, i32) {
    %c0_i32 = arith.constant 0 : i32
    %c0_i32_0 = arith.constant 0 : i32
    %c0_i32_1 = arith.constant 0 : i32
    return %c0_i32, %c0_i32_0 : i32, i32
  }
  func.func @transform_3(%arg0: i32) -> (i32, i32) {
    %c0_i32 = arith.constant 0 : i32
    %c0_i32_0 = arith.constant 0 : i32
    %c0_i32_1 = arith.constant 0 : i32
    return %c0_i32, %c0_i32_0 : i32, i32
  }
  func.func @transform_4(%arg0: i32) -> (i32, i32) {
    %c0_i32 = arith.constant 0 : i32
    %c0_i32_0 = arith.constant 0 : i32
    %c0_i32_1 = arith.constant 0 : i32
    return %c0_i32, %c0_i32_0 : i32, i32
  }
  func.func @transform_5(%arg0: i32) -> (i32, i32) {
    %c0_i32 = arith.constant 0 : i32
    %c0_i32_0 = arith.constant 0 : i32
    return %c0_i32, %arg0 : i32, i32
  }
  func.func @transform_6(%arg0: i32) -> (i32, i32) {
    %c0_i32 = arith.constant 0 : i32
    %c0_i32_0 = arith.constant 0 : i32
    return %c0_i32, %arg0 : i32, i32
  }
  func.func @transform_7(%arg0: i32) -> (i32, i32, i32) {
    %c0_i32 = arith.constant 0 : i32
    %c0_i32_0 = arith.constant 0 : i32
    %c0_i32_1 = arith.constant 0 : i32
    return %c0_i32, %c0_i32_0, %arg0 : i32, i32, i32
  }
}

</mosaic_0001>

<bundles_post_ra>
// kernel: tpu_custom_call.1
= control target key start
LH: loop header
LB: loop body
LE: loop exit
PB: predicated region body
PF: predicated region fallthrough
CT: control target
= control target key end

     0   :  { %12 = vsyncpa [#allocation3], 0  ;;  %s849_s0 = inlined_call_operand.hbm [shape: f32[2,16,256], index: 0, kind: input, shape index: {}]   ;;  %s850_s1 = inlined_call_operand.vmem [shape: f32[2,16], index: 1, kind: input, shape index: {}]   ;;  %s851_s2 = inlined_call_operand.vmem [shape: f32[2,1], index: 2, kind: input, shape index: {}]   ;;  %s852_s3 = inlined_call_operand.vmem [shape: f32[16,2], index: 3, kind: input, shape index: {}]   ;;  %s853_s4 = inlined_call_operand.vmem [shape: f32[16,1], index: 4, kind: input, shape index: {}]   ;;  %s854_s5 = inlined_call_operand.vmem [shape: f32[16,256], index: 5, kind: input, shape index: {}]   ;;  %s855_s6 = inlined_call_operand.hbm [shape: f32[16,256], index: 6, kind: input, shape index: {}]   ;;  %s856_s7 = inlined_call_operand.hbm [shape: f32[2,16,256], index: 7, kind: output, shape index: {}]  }
   0x1   :  { %13 = vsyncpa [#allocation6], 0 }
   0x2   :  { %14 = vsyncpa [#allocation4], 0  ;;  %s687_s24 = smov [#allocation2]   ;;  %s615_s28 = scalar_lea.hbm %s849_s0, 1024 }
   0x3   :  { %s20_s25 = sshll.u32 %s687_s24, 4  ;;  %p616_p0 = scmp.ne.s32.totalorder %s849_s0, %s615_s28  ;;  %s21_s25 = int_to_ptr.vmem [resolvable:$true] %s20_s25 }
   0x4   :  { %p619_p1 = scmp.lt.u32.totalorder %s615_s28, %s849_s0 }
   0x6   :  { %p621_p2 = pnand %p619_p1, %p616_p0 }
   0x8   :  { %624 = shalt.err (!%p621_p2)
}
   0x9   :  { %s625_s10 = scalar_lea.vmem %s21_s25, 1024  ;;  %p630_p4 = scmp.lt.s32.totalorder %s21_s25, %s21_s25 }
   0xa   :  { %p626_p3 = scmp.ne.s32.totalorder %s21_s25, %s625_s10  ;;  %p631_p5 = scmp.lt.s32.totalorder %s625_s10, %s625_s10 }
   0xc   :  { %p632_p6 = por %p631_p5, %p630_p4 }
   0xe   :  { %p633_p7 = pnand %p632_p6, %p626_p3 }
  0x10   :  { %636 = shalt.err (!%p633_p7)
}
  0x11   :  { %s688_s11 = smov 256   ;;  %s689_s12 = smov 16  }
  0x12   :  { %26 = dma.hbm_to_vmem [thread:$0]  %s849_s0, 1024, %s21_s25, [#allocation3], %s688_s11, %s688_s11, %s689_s12  }
  0x13   :  { %s690_s15 = smov [#allocation5]   ;;  %s637_s19 = scalar_lea.hbm %s855_s6, 512 }
  0x14   :  { %s42_s16 = sshll.u32 %s690_s15, 4  ;;  %p638_p8 = scmp.ne.s32.totalorder %s855_s6, %s637_s19  ;;  %s43_s16 = int_to_ptr.vmem [resolvable:$true] %s42_s16 }
  0x15   :  { %p641_p9 = scmp.lt.u32.totalorder %s637_s19, %s855_s6 }
  0x17   :  { %p643_p10 = pnand %p641_p9, %p638_p8 }
  0x19   :  { %646 = shalt.err (!%p643_p10)
}
  0x1a   :  { %s647_s24 = scalar_lea.vmem %s43_s16, 512  ;;  %p652_p12 = scmp.lt.s32.totalorder %s43_s16, %s43_s16 }
  0x1b   :  { %p648_p11 = scmp.ne.s32.totalorder %s43_s16, %s647_s24  ;;  %p653_p13 = scmp.lt.s32.totalorder %s647_s24, %s647_s24 }
  0x1d   :  { %p654_p0 = por %p653_p13, %p652_p12 }
  0x1f   :  { %p655_p1 = pnand %p654_p0, %p648_p11 }
  0x21   :  { %658 = shalt.err (!%p655_p1)
}
  0x22   :  { %48 = dma.hbm_to_vmem [thread:$0]  %s855_s6, 512, %s43_s16, [#allocation6], %s688_s11, %s688_s11, %s689_s12  }
  0x23   :  { %681 = dma.done.wait [#allocation3], 1024  }
  0x24   :  { %682 = vsyncadd [#allocation3], 4294966272 }
  0x25   :  { %683 = dma.done.wait [#allocation6], 512  }
  0x26   :  { %684 = vsyncadd [#allocation6], 4294966784  ;;  %v691_v0 = vmov 0.0   ;;  %v692_v1 = vmov 0   ;;  %v764_v2 = vld [vmem:[#allocation2 + $0x8] sm:$0xff]  ;;  %v766_v3 = vld [vmem:[#allocation2 + $0x18] sm:$0xff] }
  0x27   :  { %151 = vmatprep.mubr.f32.mxu0 %v691_v0  ;;  %222 = vmatprep.mubr.f32.mxu1 %v691_v0  ;;  %v768_v4 = vld [vmem:[#allocation2 + $0x28] sm:$0xff]  ;;  %v558_v5 = vpack.c.bf16 %v766_v3, %v764_v2  ;;  %v772_v6 = vld [vmem:[#allocation2 + $0x38] sm:$0xff]  ;;  %v774_v7 = vld [vmem:[#allocation2] sm:$0xff]  ;;  %vm83_vm0 = vcmask 130048   ;;  %vm250_vm1 = vcmask 1041408   ;;  %vm243_vm2 = vcmask 15360  }
  0x28   :  { %573 = vset.pattern.permute.xlu0 %v692_v1  ;;  %574 = vset.pattern.permute.xlu1 %v692_v1  ;;  %v776_v8 = vld [vmem:[#allocation2 + $0x10] sm:$0xff]  ;;  %v562_v9 = vpack.c.bf16 %v772_v6, %v768_v4  ;;  %v782_v11 = vld [vmem:[#allocation2 + $0x20] sm:$0xff]  ;;  %v60_v17 = vld [vmem:[%s853_s4 + $0x8] sm:$0xff]  ;;  %s693_s20 = smov [#allocation7]  }
  0x29   :  { %v560_v10 = vpack.c.bf16 %v776_v8, %v774_v7  ;;  %v784_v12 = vld [vmem:[#allocation2 + $0x30] sm:$0xff]  ;;  %559 = vmatprep.subr.bf16.mxu0 %v558_v5  ;;  %v56_v14 = vld [vmem:[%s851_s2] sm:$0x3]  ;;  %240 = vperm.xlu1 %574, %v60_v17   ;;  %v58_v32 = vld [vmem:[%s852_s3 + $0x8] sm:$0xff]  ;;  %s535_s21 = sshll.u32 %s693_s20, 4  ;;  %s536_s21 = int_to_ptr.vmem [resolvable:$true] %s535_s21 }
  0x2a   :  { %v564_v13 = vpack.c.bf16 %v784_v12, %v782_v11  ;;  %563 = vmatprep.subr.bf16.mxu1 %v562_v9  ;;  %v55_v15 = vld [vmem:[%s850_s1] sm:$0x3]  ;;  %80 = vperm.xlu0 %573, %v56_v14   ;;  %p664_p3 = scmp.lt.s32.totalorder %s536_s21, %s536_s21 }
  0x2b   :  { %561 = vmatpush1.bf16.msra.mxu0 %v560_v10  ;;  %v59_v16 = vld [vmem:[%s853_s4] sm:$0xff] }
  0x2c   :  { %565 = vmatpush1.bf16.msra.mxu1 %v564_v13  ;;  %v57_v30 = vld [vmem:[%s852_s3] sm:$0xff] }
  0x2e   :  { %548 = vmatmul.mubr.msk.f32.vlgmr.msra.gmra.mrb[0].mxu0 %vm83_vm0, %v55_v15  ;;  %235 = vperm.xlu0 %573, %v59_v16  }
  0x2f   :  { %549 = vmatmul.mubr.msk.f32.vlgmr.msra.gmra.mrb[0].mxu1 %vm83_vm0, %v55_v15  ;;  %327 = vmatprep.mubr.f32.mxu0 %v691_v0 }
  0x30   :  { %404 = vmatprep.mubr.f32.mxu1 %v691_v0 }
  0xa8   :  { %v241_v41 = vpop.permute.xlu1 %240 }
  0xa9   :  { %v81_v18 = vpop.permute.xlu0 %80 }
  0xad   :  { %v236_v33 = vpop.permute.xlu0 %235 }
 0x101   :  { %v153_v19 = vpop.f32.mrb[0].mxu0 }
 0x102   :  { %v154_v20 = vadd.f32 %v153_v19, %v81_v18  ;;  %v224_v21 = vpop.f32.mrb[0].mxu1  ;;  %v155_v22 = vpop.f32.mrb[1].mxu0 }
 0x103   :  { %v225_v23 = vadd.f32 %v224_v21, %v81_v18  ;;  %v156_v24 = vadd.f32 %v155_v22, %v81_v18  ;;  %v226_v25 = vpop.f32.mrb[1].mxu1 }
 0x104   :  { %v227_v26 = vadd.f32 %v226_v25, %v81_v18  ;;  %v229_v28 = vmax.f32 %v154_v20, 0.0 }
 0x105   :  { %v230_v27 = vmax.f32 %v156_v24, 0.0  ;;  %v231_v31 = vmax.f32 %v225_v23, 0.0 }
 0x106   :  { %v232_v29 = vmax.f32 %v227_v26, 0.0 }
 0x107   :  { %550 = vmatprep.subr.msk.mxu0 %vm250_vm1, %v230_v27 }
 0x108   :  { %554 = vmatprep.subr.msk.mxu1 %vm250_vm1, %v232_v29  ;;  %551 = vmatpush1.msk.msra.mxu0 %vm250_vm1, %v229_v28 }
 0x109   :  { %555 = vmatpush1.msk.msra.mxu1 %vm250_vm1, %v231_v31  ;;  %552 = vmatmul.mubr.msk.f32.vlgmr.msra.gmra.mrb[2].mxu0 %vm243_vm2, %v57_v30 }
 0x10a   :  { %556 = vmatmul.mubr.msk.f32.vlgmr.msra.gmra.mrb[2].mxu1 %vm243_vm2, %v57_v30  ;;  %333 = vmatprep.mubr.f32.mxu0 %v691_v0 }
 0x10b   :  { %410 = vmatprep.mubr.f32.mxu1 %v691_v0 }
 0x10d   :  { %553 = vmatmul.mubr.msk.f32.gmra.mrb[4].mxu0 %vm243_vm2, %v58_v32 }
 0x10e   :  { %557 = vmatmul.mubr.msk.f32.gmra.mrb[4].mxu1 %vm243_vm2, %v58_v32 }
 0x1dc   :  { %v329_v34 = vpop.f32.mrb[2].mxu0 }
 0x1dd   :  { %v330_v35 = vadd.f32 %v329_v34, %v236_v33  ;;  %v406_v36 = vpop.f32.mrb[2].mxu1  ;;  %v331_v37 = vpop.f32.mrb[3].mxu0 }
 0x1de   :  { %v407_v38 = vadd.f32 %v406_v36, %v236_v33  ;;  %v332_v39 = vadd.f32 %v331_v37, %v236_v33  ;;  %v408_v40 = vpop.f32.mrb[3].mxu1 }
 0x1df   :  { %v417_v42 = vsub.f32 0.0, %v330_v35  ;;  %v409_v43 = vadd.f32 %v408_v40, %v236_v33 }
 0x1e0   :  { %v419_v44 = vsub.f32 0.0, %v407_v38  ;;  %v418_v45 = vsub.f32 0.0, %v332_v39  ;;  %v335_v46 = vpop.f32.mrb[4].mxu0 }
 0x1e1   :  { %v425_v47 = vmul.f32 1.442695, %v417_v42  ;;  %v420_v48 = vsub.f32 0.0, %v409_v43  ;;  %v336_v49 = vadd.f32 %v335_v46, %v241_v41  ;;  %v412_v50 = vpop.f32.mrb[4].mxu1  ;;  %v337_v51 = vpop.f32.mrb[5].mxu0 }
 0x1e2   :  { %v429_v52 = vmul.f32 1.442695, %v419_v44  ;;  %v427_v53 = vmul.f32 1.442695, %v418_v45  ;;  %v413_v54 = vadd.f32 %v412_v50, %v241_v41  ;;  %v338_v55 = vadd.f32 %v337_v51, %v241_v41  ;;  %v414_v56 = vpop.f32.mrb[5].mxu1 }
 0x1e3   :  { %575 = vpow2.f32 %v425_v47  ;;  %v431_v57 = vmul.f32 1.442695, %v420_v48  ;;  %v421_v58 = vsub.f32 0.0, %v336_v49  ;;  %v415_v59 = vadd.f32 %v414_v56, %v241_v41 }
 0x1e4   :  { %577 = vpow2.f32 %v429_v52  ;;  %v423_v60 = vsub.f32 0.0, %v413_v54  ;;  %v422_v61 = vsub.f32 0.0, %v338_v55 }
 0x1e5   :  { %579 = vpow2.f32 %v427_v53  ;;  %v433_v62 = vmul.f32 1.442695, %v421_v58  ;;  %v424_v63 = vsub.f32 0.0, %v415_v59 }
 0x1e6   :  { %581 = vpow2.f32 %v431_v57  ;;  %v437_v0 = vmul.f32 1.442695, %v423_v60  ;;  %v435_v1 = vmul.f32 1.442695, %v422_v61 }
 0x1e7   :  { %583 = vpow2.f32 %v433_v62  ;;  %v439_v5 = vmul.f32 1.442695, %v424_v63 }
 0x1e8   :  { %585 = vpow2.f32 %v437_v0 }
 0x1e9   :  { %587 = vpow2.f32 %v435_v1  ;;  %v62_v1 = vld [vmem:[%s854_s5 + $0x8] sm:$0xff] }
 0x1ea   :  { %589 = vpow2.f32 %v439_v5 }
 0x1ed   :  { %v576_v9 = vpop.eup %575 }
 0x1ee   :  { %v578_v10 = vpop.eup %577  ;;  %v441_v13 = vadd.f32 1.0, %v576_v9 }
 0x1ef   :  { %v580_v14 = vpop.eup %579  ;;  %v443_v15 = vadd.f32 1.0, %v578_v10  ;;  %v65_v10 = vld [vmem:[#allocation5] sm:$0xff] }
 0x1f0   :  { %v582_v16 = vpop.eup %581  ;;  %591 = vrcp.f32 %v441_v13  ;;  %v442_v17 = vadd.f32 1.0, %v580_v14  ;;  %v63_v13 = vld [vmem:[%s854_s5 + $0x10] sm:$0xff] }
 0x1f1   :  { %v584_v18 = vpop.eup %583  ;;  %593 = vrcp.f32 %v443_v15  ;;  %v444_v19 = vadd.f32 1.0, %v582_v16 }
 0x1f2   :  { %v586_v20 = vpop.eup %585  ;;  %595 = vrcp.f32 %v442_v17  ;;  %v445_v21 = vadd.f32 1.0, %v584_v18  ;;  %v66_v17 = vld [vmem:[#allocation5 + $0x8] sm:$0xff]  ;;  %v64_v18 = vld [vmem:[%s854_s5 + $0x18] sm:$0xff] }
 0x1f3   :  { %v588_v22 = vpop.eup %587  ;;  %597 = vrcp.f32 %v444_v19  ;;  %v447_v23 = vadd.f32 1.0, %v586_v20 }
 0x1f4   :  { %v590_v24 = vpop.eup %589  ;;  %599 = vrcp.f32 %v445_v21  ;;  %v446_v25 = vadd.f32 1.0, %v588_v22 }
 0x1f5   :  { %601 = vrcp.f32 %v447_v23  ;;  %v448_v26 = vadd.f32 1.0, %v590_v24  ;;  %v67_v24 = vld [vmem:[#allocation5 + $0x10] sm:$0xff] }
 0x1f6   :  { %603 = vrcp.f32 %v446_v25 }
 0x1f7   :  { %605 = vrcp.f32 %v448_v26 }
 0x1fa   :  { %v592_v27 = vpop.eup %591 }
 0x1fb   :  { %v594_v28 = vpop.eup %593  ;;  %v465_v29 = vmul.f32 %v592_v27, %v774_v7 }
 0x1fc   :  { %v596_v30 = vpop.eup %595  ;;  %v473_v31 = vmul.f32 %v594_v28, %v782_v11 }
 0x1fd   :  { %v598_v32 = vpop.eup %597  ;;  %v469_v33 = vadd.f32 %v465_v29, %v774_v7  ;;  %v466_v34 = vmul.f32 %v596_v30, %v764_v2  ;;  %v68_v29 = vld [vmem:[#allocation5 + $0x18] sm:$0xff] }
 0x1fe   :  { %v600_v35 = vpop.eup %599  ;;  %v477_v36 = vadd.f32 %v473_v31, %v782_v11  ;;  %v474_v37 = vmul.f32 %v598_v32, %v768_v4 }
 0x1ff   :  { %v602_v38 = vpop.eup %601  ;;  %v470_v39 = vadd.f32 %v466_v34, %v764_v2  ;;  %v467_v40 = vmul.f32 %v600_v35, %v776_v8 }
 0x200   :  { %v604_v41 = vpop.eup %603  ;;  %v481_v42 = vadd.f32 %v477_v36, %v469_v33  ;;  %v478_v43 = vadd.f32 %v474_v37, %v768_v4  ;;  %v475_v44 = vmul.f32 %v602_v38, %v784_v12 }
 0x201   :  { %v606_v45 = vpop.eup %605  ;;  %v471_v7 = vadd.f32 %v467_v40, %v776_v8  ;;  %v468_v46 = vmul.f32 %v604_v41, %v766_v3 }
 0x202   :  { %v485_v47 = vmul.f32 0.5, %v481_v42  ;;  %v482_v11 = vadd.f32 %v478_v43, %v470_v39  ;;  %v479_v48 = vadd.f32 %v475_v44, %v784_v12  ;;  %v476_v49 = vmul.f32 %v606_v45, %v772_v6 }
 0x203   :  { %v472_v2 = vadd.f32 %v468_v46, %v766_v3 }
 0x204   :  { %v489_v50 = vsub.f32 %v485_v47, %v477_v36  ;;  %v486_v51 = vmul.f32 0.5, %v482_v11  ;;  %v483_v52 = vadd.f32 %v479_v48, %v471_v7  ;;  %v480_v4 = vadd.f32 %v476_v49, %v772_v6  ;;  %v61_v6 = vld [vmem:[%s854_s5] sm:$0xff]  ;;  %s659_s5 = scalar_lea.vmem %s536_s21, 1024 }
 0x205   :  { %p660_p2 = scmp.ne.s32.totalorder %s536_s21, %s659_s5  ;;  %p665_p4 = scmp.lt.s32.totalorder %s659_s5, %s659_s5 }
 0x206   :  { %v493_v53 = vmul.f32 %v489_v50, %v489_v50  ;;  %v490_v54 = vsub.f32 %v486_v51, %v478_v43  ;;  %v487_v55 = vmul.f32 0.5, %v483_v52  ;;  %v484_v56 = vadd.f32 %v480_v4, %v472_v2 }
 0x207   :  { %p666_p5 = por %p665_p4, %p664_p3 }
 0x208   :  { %v497_v8 = vadd.f32 1e-05, %v493_v53  ;;  %v494_v57 = vmul.f32 %v490_v54, %v490_v54  ;;  %v491_v58 = vsub.f32 %v487_v55, %v479_v48  ;;  %v488_v59 = vmul.f32 0.5, %v484_v56 }
 0x209   :  { %p667_p6 = pnand %p666_p5, %p660_p2 }
 0x20a   :  { %607 = vrsqrt.f32 %v497_v8  ;;  %v498_v60 = vadd.f32 1e-05, %v494_v57  ;;  %v495_v12 = vmul.f32 %v491_v58, %v491_v58  ;;  %v492_v61 = vsub.f32 %v488_v59, %v480_v4 }
 0x20c   :  { %609 = vrsqrt.f32 %v498_v60  ;;  %v499_v62 = vadd.f32 1e-05, %v495_v12  ;;  %v496_v3 = vmul.f32 %v492_v61, %v492_v61 }
 0x20e   :  { %611 = vrsqrt.f32 %v499_v62  ;;  %v500_v63 = vadd.f32 1e-05, %v496_v3 }
 0x210   :  { %613 = vrsqrt.f32 %v500_v63 }
 0x214   :  { %v608_v0 = vpop.eup %607 }
 0x215   :  { %v505_v5 = vmul.f32 %v608_v0, %v61_v6 }
 0x216   :  { %v610_v9 = vpop.eup %609 }
 0x217   :  { %v509_v14 = vmul.f32 %v505_v5, %v489_v50  ;;  %v506_v15 = vmul.f32 %v610_v9, %v62_v1 }
 0x218   :  { %v612_v16 = vpop.eup %611 }
 0x219   :  { %v513_v19 = vadd.f32 %v509_v14, %v65_v10  ;;  %v521_v20 = vsub.f32 %v65_v10, %v509_v14  ;;  %v510_v21 = vmul.f32 %v506_v15, %v490_v54  ;;  %v507_v22 = vmul.f32 %v612_v16, %v63_v13 }
 0x21a   :  { %v614_v23 = vpop.eup %613 }
 0x21b   :  { %517 = vst [vmem:[#allocation7] sm:$0xff] %v513_v19  ;;  %526 = vst [vmem:[#allocation7 + $0x20] sm:$0xff] %v521_v20  ;;  %v514_v25 = vadd.f32 %v510_v21, %v66_v17  ;;  %v522_v26 = vsub.f32 %v66_v17, %v510_v21  ;;  %v511_v27 = vmul.f32 %v507_v22, %v491_v58 }
 0x21c   :  { %v508_v28 = vmul.f32 %v614_v23, %v64_v18 }
 0x21d   :  { %518 = vst [vmem:[#allocation7 + $0x8] sm:$0xff] %v514_v25  ;;  %527 = vst [vmem:[#allocation7 + $0x28] sm:$0xff] %v522_v26  ;;  %v515_v30 = vadd.f32 %v511_v27, %v67_v24  ;;  %v523_v31 = vsub.f32 %v67_v24, %v511_v27 }
 0x21e   :  { %v512_v32 = vmul.f32 %v508_v28, %v492_v61 }
 0x21f   :  { %519 = vst [vmem:[#allocation7 + $0x10] sm:$0xff] %v515_v30  ;;  %528 = vst [vmem:[#allocation7 + $0x30] sm:$0xff] %v523_v31 }
 0x220   :  { %v516_v33 = vadd.f32 %v512_v32, %v68_v29  ;;  %v524_v34 = vsub.f32 %v68_v29, %v512_v32 }
 0x222   :  { %520 = vst [vmem:[#allocation7 + $0x18] sm:$0xff] %v516_v33  ;;  %529 = vst [vmem:[#allocation7 + $0x38] sm:$0xff] %v524_v34 }
 0x223   :  { %670 = shalt.err (!%p667_p6)
}
 0x224   :  { %s671_s24 = scalar_lea.hbm %s856_s7, 1024 }
 0x225   :  { %p672_p7 = scmp.ne.s32.totalorder %s856_s7, %s671_s24  ;;  %p675_p8 = scmp.lt.u32.totalorder %s671_s24, %s856_s7 }
 0x227   :  { %p677_p9 = pnand %p675_p8, %p672_p7 }
 0x229   :  { %680 = shalt.err (!%p677_p9)
}
 0x22a   :  { %541 = dma.vmem_to_hbm [thread:$0]  %s536_s21, 1024, %s856_s7, [#allocation4], %s688_s11, %s688_s11, %s689_s12  }
 0x22b   :  { %685 = dma.done.wait [#allocation4], 1024  }
 0x22c   :  { %686 = vsyncadd [#allocation4], 4294966272 }
 0x22d   :  { %545 = vsyncpa [#allocation3], 1 }
 0x22e   :  { %546 = vsyncpa [#allocation6], 1 }
 0x22f   :  { %547 = vsyncpa [#allocation4], 1 }

</bundles_post_ra>
